<compile_context>
chip_gen: v7x
topology: tpu7x:2x2x1
jax: 0.10.0
libtpu: 0.0.40
codegen_flags: <defaults>
</compile_context>

<pallas_src>
import functools

import jax
import jax.numpy as jnp
from jax.experimental import pallas as pl
from jax.experimental.pallas import tpu as pltpu


def _round_up(x, m):
    return ((x + m - 1) // m) * m


def _focal_power(x, gamma):
    """(1-pt)**gamma without a float-exponent pow for common gammas."""
    if gamma == 0.0:
        return jnp.ones_like(x)
    gi = int(gamma)
    if float(gi) == gamma and 1 <= gi <= 8:
        r = x
        for _ in range(gi - 1):
            r = r * x          # gamma == 2.0 -> a single VPU multiply
        return r
    return jnp.power(x, jnp.float32(gamma))


def _focal_loss_kernel(logits_ref, targets_ref, out_ref, *, gamma, alpha,
                       reduction, total_n):
    i = pl.program_id(0)

    logits = logits_ref[...].astype(jnp.float32)              # (TN, C)
    tgt = targets_ref[...]                                     # (TN, 1) int32
    tn, c = logits.shape

    # --- numerically-stable log-softmax / cross-entropy ----------------------
    row_max = jnp.max(logits, axis=1, keepdims=True)           # (TN, 1)
    shifted = logits - row_max                                 # (TN, C)
    log_denom = jnp.log(jnp.sum(jnp.exp(shifted), axis=1, keepdims=True))

    # one-hot via lane iota compare (no gather needed on TPU)
    lane_idx = jax.lax.broadcasted_iota(jnp.int32, (tn, c), 1)
    onehot = (lane_idx == tgt).astype(jnp.float32)             # (TN, C)
    tgt_shift = jnp.sum(shifted * onehot, axis=1, keepdims=True)

    ce = log_denom - tgt_shift                                 # (TN, 1)

    # pt = softmax[target] = exp(-ce); EUP exp replaces a second masked
    # reduce + divide over the full (TN, C) tile.
    pt = jnp.exp(-ce)
    one_minus_pt = jnp.maximum(1.0 - pt, 0.0)
    focal_w = _focal_power(one_minus_pt, gamma)                # (TN, 1)

    if alpha is not None:
        # Binary-classification alpha semantics of the reference module:
        # alpha tensor = [alpha, 1-alpha]; alpha_t = alpha[target].
        alpha_t = jnp.where(tgt == 0, jnp.float32(alpha), jnp.float32(1.0 - alpha))
        focal_w = alpha_t * focal_w

    fl = focal_w * ce                                          # (TN, 1)

    # Mask rows of the last (padded) tile so they contribute exactly zero.
    row_idx = i * tn + jax.lax.broadcasted_iota(jnp.int32, (tn, 1), 0)
    fl = jnp.where(row_idx < total_n, fl, 0.0)

    if reduction == "none":
        out_ref[...] = fl
    else:
        # Lane-dense per-tile partial sum; final sum / mean done in wrapper.
        partial = jnp.sum(fl)
        out_ref[...] = jnp.broadcast_to(partial, (1, 1, 128)).astype(jnp.float32)


def focal_loss(logits, targets, *, gamma=2.0, alpha=None, reduction="mean",
               block_rows=8192):
    """Pallas TPU FocalLoss forward.

    logits:  (N, C) float array
    targets: (N,)   int array of class indices
    alpha:   None or a scalar (binary [alpha, 1-alpha] semantics, as in the
             reference PyTorch module when alpha is a float/int).
    """
    # TODO(synk): tensor-valued (per-class) alpha is not supported; only the
    # module's float/int -> [alpha, 1-alpha] binary path is implemented.
    n, c = logits.shape

    if reduction == "none":
        block_rows = min(block_rows, 4096)   # extra VMEM for the per-row output
    tn = min(block_rows, _round_up(n, 8))    # multiple of 8 (sublane tiling)
    n_pad = _round_up(n, tn)
    g = n_pad // tn

    logits_p = logits
    targets_p = targets.astype(jnp.int32)
    if n_pad != n:
        logits_p = jnp.pad(logits_p, ((0, n_pad - n), (0, 0)))
        targets_p = jnp.pad(targets_p, ((0, n_pad - n),))
    targets_2d = targets_p.reshape(n_pad, 1)

    in_specs = [
        pl.BlockSpec((tn, c), lambda i: (i, 0)),
        pl.BlockSpec((tn, 1), lambda i: (i, 0)),
    ]

    if reduction in ("mean", "sum"):
        out_shape = jax.ShapeDtypeStruct((g, 1, 128), jnp.float32)
        out_specs = pl.BlockSpec((1, 1, 128), lambda i: (i, 0, 0))
    else:
        out_shape = jax.ShapeDtypeStruct((n_pad, 1), jnp.float32)
        out_specs = pl.BlockSpec((tn, 1), lambda i: (i, 0))

    kernel = functools.partial(
        _focal_loss_kernel,
        gamma=float(gamma),
        alpha=None if alpha is None else float(alpha),
        reduction=reduction,
        total_n=n,
    )

    out = pl.pallas_call(
        kernel,
        out_shape=out_shape,
        grid=(g,),
        in_specs=in_specs,
        out_specs=out_specs,
        compiler_params=pltpu.CompilerParams(
            dimension_semantics=("parallel",),       # no carried accumulator
            vmem_limit_bytes=32 * 1024 * 1024,       # safe on v5e/v6e/v7x
        ),
    )(logits_p, targets_2d)

    inv_n = 1.0 / float(n)
    if reduction == "mean":
        return jnp.sum(out[:, 0, 0]) * inv_n
    if reduction == "sum":
        return jnp.sum(out[:, 0, 0])
    return out[:n, 0]


def _focal_loss_ref(logits, targets, *, gamma=2.0, alpha=None, reduction="mean"):
    """Pure-JAX reference mirroring the PyTorch module."""
    logits = logits.astype(jnp.float32)
    logp = jax.nn.log_softmax(logits, axis=1)
    onehot = jax.nn.one_hot(targets, logits.shape[1], dtype=jnp.float32)
    ce = -jnp.sum(logp * onehot, axis=1)
    pt = jnp.sum(jax.nn.softmax(logits, axis=1) * onehot, axis=1)
    fw = (1.0 - pt) ** gamma
    if alpha is not None:
        alpha_t = jnp.where(targets == 0, alpha, 1.0 - alpha)
        fw = alpha_t * fw
    fl = fw * ce
    if reduction == "mean":
        return fl.mean()
    if reduction == "sum":
        return fl.sum()
    return fl


if __name__ == "__main__":
    key = jax.random.PRNGKey(0)
    k1, k2, k3, k4 = jax.random.split(key, 4)

    # Primary case: module defaults (gamma=2.0, alpha=None, reduction='mean').
    N, C = 64, 10
    logits = jax.random.normal(k1, (N, C), dtype=jnp.float32)
    targets = jax.random.randint(k2, (N,), 0, C, dtype=jnp.int32)

    loss = jax.block_until_ready(focal_loss(logits, targets))
    ref = _focal_loss_ref(logits, targets)
    assert jnp.allclose(loss, ref, rtol=1e-4, atol=1e-5), (loss, ref)

    # Multi-tile case: exercises the grid, last-tile padding mask and all
    # reduction modes (small block_rows forces several grid steps).
    N2 = 1000
    logits2 = jax.random.normal(k3, (N2, C), dtype=jnp.float32)
    targets2 = jax.random.randint(k4, (N2,), 0, C, dtype=jnp.int32)
    for red in ("mean", "sum", "none"):
        out = jax.block_until_ready(
            focal_loss(logits2, targets2, reduction=red, block_rows=256))
        ref2 = _focal_loss_ref(logits2, targets2, reduction=red)
        assert jnp.allclose(out, ref2, rtol=1e-4, atol=1e-4), (red, out, ref2)

    # Binary alpha path (alpha_t = alpha if target==0 else 1-alpha).
    tgt_bin = jax.random.randint(k2, (N,), 0, 2, dtype=jnp.int32)
    logits_bin = logits[:, :2]
    la = jax.block_until_ready(focal_loss(logits_bin, tgt_bin, alpha=0.25))
    ra = _focal_loss_ref(logits_bin, tgt_bin, alpha=0.25)
    assert jnp.allclose(la, ra, rtol=1e-4, atol=1e-5), (la, ra)

    print("KERNEL_OK")
</pallas_src>

<mosaic_0001>
module attributes {stable_mosaic.version = 11 : i64} {
  func.func @_focal_loss_kernel(%arg0: i32, %arg1: memref<64x10xf32, #tpu.memory_space<vmem>>, %arg2: memref<64x1xi32, #tpu.memory_space<vmem>>, %arg3: memref<1x1x128xf32, #tpu.memory_space<vmem>>) attributes {dimension_semantics = [#tpu.dimension_semantics<parallel>], iteration_bounds = array<i64: 1>, scalar_prefetch = 0 : i64, scratch_operands = 0 : i64, tpu.core_type = #tpu.core_type<tc>, window_params = [{transform_indices = @transform_0, window_bounds = array<i64: 64, 10>}, {transform_indices = @transform_1, window_bounds = array<i64: 64, 1>}, {transform_indices = @transform_2, window_bounds = array<i64: 1, 1, 128>}]} {
    %c0 = arith.constant 0 : index
    %c0_0 = arith.constant 0 : index
    %0 = vector.load %arg1[%c0, %c0_0] : memref<64x10xf32, #tpu.memory_space<vmem>>, vector<64x10xf32>
    %c0_1 = arith.constant 0 : index
    %c0_2 = arith.constant 0 : index
    %1 = vector.load %arg2[%c0_1, %c0_2] : memref<64x1xi32, #tpu.memory_space<vmem>>, vector<64x1xi32>
    %cst = arith.constant dense<0xFF800000> : vector<64xf32>
    %2 = vector.multi_reduction <maximumf>, %0, %cst [1] : vector<64x10xf32> to vector<64xf32>
    %3 = vector.shape_cast %2 : vector<64xf32> to vector<64x1xf32>
    %4 = vector.broadcast %3 : vector<64x1xf32> to vector<64x10xf32>
    %5 = arith.subf %0, %4 : vector<64x10xf32>
    %6 = math.exp %5 : vector<64x10xf32>
    %cst_3 = arith.constant dense<0.000000e+00> : vector<64xf32>
    %7 = vector.multi_reduction <add>, %6, %cst_3 [1] : vector<64x10xf32> to vector<64xf32>
    %8 = vector.shape_cast %7 : vector<64xf32> to vector<64x1xf32>
    %9 = math.log %8 : vector<64x1xf32>
    %10 = tpu.iota {dimensions = array<i32: 1>} : vector<64x10xi32>
    %11 = vector.broadcast %1 : vector<64x1xi32> to vector<64x10xi32>
    %12 = arith.cmpi eq, %10, %11 : vector<64x10xi32>
    %13 = arith.extui %12 : vector<64x10xi1> to vector<64x10xi32>
    %14 = arith.sitofp %13 : vector<64x10xi32> to vector<64x10xf32>
    %15 = arith.mulf %5, %14 : vector<64x10xf32>
    %cst_4 = arith.constant dense<0.000000e+00> : vector<64xf32>
    %16 = vector.multi_reduction <add>, %15, %cst_4 [1] : vector<64x10xf32> to vector<64xf32>
    %17 = vector.shape_cast %16 : vector<64xf32> to vector<64x1xf32>
    %18 = arith.subf %9, %17 : vector<64x1xf32>
    %cst_5 = arith.constant 0.000000e+00 : f32
    %19 = vector.broadcast %cst_5 : f32 to vector<64x1xf32>
    %20 = arith.subf %19, %18 : vector<64x1xf32>
    %21 = math.exp %20 : vector<64x1xf32>
    %cst_6 = arith.constant 1.000000e+00 : f32
    %22 = vector.broadcast %cst_6 : f32 to vector<64x1xf32>
    %23 = arith.subf %22, %21 : vector<64x1xf32>
    %cst_7 = arith.constant 0.000000e+00 : f32
    %24 = vector.broadcast %cst_7 : f32 to vector<64x1xf32>
    %25 = arith.maximumf %23, %24 : vector<64x1xf32>
    %26 = arith.mulf %25, %25 : vector<64x1xf32>
    %27 = arith.mulf %26, %18 : vector<64x1xf32>
    %c64_i32 = arith.constant 64 : i32
    %28 = arith.muli %arg0, %c64_i32 : i32
    %29 = tpu.iota {dimensions = array<i32: 0>} : vector<64x1xi32>
    %30 = vector.broadcast %28 : i32 to vector<64x1xi32>
    %31 = arith.addi %30, %29 : vector<64x1xi32>
    %c64_i32_8 = arith.constant 64 : i32
    %32 = vector.broadcast %c64_i32_8 : i32 to vector<64x1xi32>
    %33 = arith.cmpi slt, %31, %32 : vector<64x1xi32>
    %cst_9 = arith.constant 0.000000e+00 : f32
    %34 = vector.broadcast %cst_9 : f32 to vector<64x1xf32>
    %35 = arith.select %33, %27, %34 : vector<64x1xi1>, vector<64x1xf32>
    %36 = vector.shape_cast %35 : vector<64x1xf32> to vector<1x64x1xf32>
    %cst_10 = arith.constant dense<0.000000e+00> : vector<1xf32>
    %37 = vector.multi_reduction <add>, %36, %cst_10 [1, 2] : vector<1x64x1xf32> to vector<1xf32>
    %38 = vector.shape_cast %37 : vector<1xf32> to vector<1x1x1xf32>
    %39 = vector.extract %38[0, 0, 0] : f32 from vector<1x1x1xf32>
    %40 = vector.broadcast %39 : f32 to vector<1x1x128xf32>
    %c0_11 = arith.constant 0 : index
    %c0_12 = arith.constant 0 : index
    %c0_13 = arith.constant 0 : index
    %41 = vector.load %arg3[%c0_11, %c0_12, %c0_13] : memref<1x1x128xf32, #tpu.memory_space<vmem>>, vector<1x1x128xf32>
    tpu.vector_store %arg3[%c0_11, %c0_12, %c0_13], %40 {strides = array<i32>} : memref<1x1x128xf32, #tpu.memory_space<vmem>>, vector<1x1x128xf32>,
    return
  }
  func.func @transform_0(%arg0: i32) -> (i32, i32) {
    %c0_i32 = arith.constant 0 : i32
    %c0_i32_0 = arith.constant 0 : i32
    return %arg0, %c0_i32 : i32, i32
  }
  func.func @transform_1(%arg0: i32) -> (i32, i32) {
    %c0_i32 = arith.constant 0 : i32
    %c0_i32_0 = arith.constant 0 : i32
    return %arg0, %c0_i32 : i32, i32
  }
  func.func @transform_2(%arg0: i32) -> (i32, i32, i32) {
    %c0_i32 = arith.constant 0 : i32
    %c0_i32_0 = arith.constant 0 : i32
    %c0_i32_1 = arith.constant 0 : i32
    return %arg0, %c0_i32, %c0_i32_0 : i32, i32, i32
  }
}

</mosaic_0001>

<bundles_post_ra>
// kernel: tpu_custom_call.1
= control target key start
LH: loop header
LB: loop body
LE: loop exit
PB: predicated region body
PF: predicated region fallthrough
CT: control target
= control target key end

     0   :  { %vm28_vm0 = vcmask 80896   ;;  %v426_v6 = vmov 0   ;;  %s580_s0 = inlined_call_operand.vmem [shape: f32[64,10], index: 0, kind: input, shape index: {}]   ;;  %s581_s1 = inlined_call_operand.vmem [shape: s32[64,1], index: 1, kind: input, shape index: {}]   ;;  %s582_s2 = inlined_call_operand.hbm [shape: f32[1,1,128], index: 2, kind: output, shape index: {}]  }
   0x1   :  { %v14_v0 = vld [vmem:[%s580_s0 + $0x10] sm:$0xff]  ;;  %v12_v1 = vld [vmem:[%s580_s0] sm:$0xff]  ;;  %v15_v2 = vld [vmem:[%s580_s0 + $0x18] sm:$0xff]  ;;  %353 = vset.pattern.permute.xlu1 %v426_v6  ;;  %352 = vset.pattern.permute.xlu0 %v426_v6 }
   0x2   :  { %v35_v3 = vsel %vm28_vm0, %v14_v0, -inf  ;;  %v29_v4 = vsel %vm28_vm0, %v12_v1, -inf  ;;  %v13_v5 = vld [vmem:[%s580_s0 + $0x8] sm:$0xff]  ;;  %v38_v7 = vsel %vm28_vm0, %v15_v2, -inf  ;;  %v16_v10 = vld [vmem:[%s580_s0 + $0x20] sm:$0xff] }
   0x3   :  { %36 = vmax.xlane.f32.xlu1 %v35_v3  ;;  %30 = vmax.xlane.f32.xlu0 %v29_v4  ;;  %v32_v8 = vsel %vm28_vm0, %v13_v5, -inf  ;;  %v17_v9 = vld [vmem:[%s580_s0 + $0x28] sm:$0xff] }
   0x4   :  { %7 = vsyncpa [#allocation3], 0  ;;  %v44_v11 = vsel %vm28_vm0, %v17_v9, -inf  ;;  %v41_v12 = vsel %vm28_vm0, %v16_v10, -inf  ;;  %v19_v13 = vld [vmem:[%s580_s0 + $0x38] sm:$0xff]  ;;  %v18_v14 = vld [vmem:[%s580_s0 + $0x30] sm:$0xff]  ;;  %v117_v48 = vlaneseq }
   0x5   :  { %v50_v15 = vsel %vm28_vm0, %v19_v13, -inf  ;;  %v47_v16 = vsel %vm28_vm0, %v18_v14, -inf  ;;  %v21_v17 = vld [vmem:[%s581_s1 + $0x8] sm:$0xff]  ;;  %v22_v18 = vld [vmem:[%s581_s1 + $0x10] sm:$0xff]  ;;  %v20_v19 = vld [vmem:[%s581_s1] sm:$0xff]  ;;  %vm298_vm9 = vcmask 7168  }
   0x6   :  { %v23_v20 = vld [vmem:[%s581_s1 + $0x18] sm:$0xff]  ;;  %v24_v21 = vld [vmem:[%s581_s1 + $0x20] sm:$0xff]  ;;  %v25_v22 = vld [vmem:[%s581_s1 + $0x28] sm:$0xff]  ;;  %v118_v54 = vand.u32 127, %v117_v48 }
   0x7   :  { %39 = vmax.xlane.f32.xlu1 %v38_v7  ;;  %33 = vmax.xlane.f32.xlu0 %v32_v8  ;;  %v26_v23 = vld [vmem:[%s581_s1 + $0x30] sm:$0xff]  ;;  %v27_v24 = vld [vmem:[%s581_s1 + $0x38] sm:$0xff]  ;;  %s428_s1 = smov [#allocation2]  }
   0x8   :  { %s331_s12 = sshll.u32 %s428_s1, 4  ;;  %s332_s12 = int_to_ptr.vmem [resolvable:$true] %s331_s12 }
   0x9   :  { %s402_s14 = scalar_lea.vmem %s332_s12, 16  ;;  %s406_s15 = scalar_lea.vmem %s332_s12, 32 }
   0xa   :  { %p403_p0 = scmp.ne.s32.totalorder %s332_s12, %s402_s14  ;;  %p407_p1 = scmp.lt.s32.totalorder %s332_s12, %s332_s12 }
   0xb   :  { %45 = vmax.xlane.f32.xlu1 %v44_v11  ;;  %42 = vmax.xlane.f32.xlu0 %v41_v12  ;;  %p408_p2 = scmp.lt.s32.totalorder %s406_s15, %s402_s14 }
   0xd   :  { %p409_p3 = por %p408_p2, %p407_p1 }
   0xf   :  { %51 = vmax.xlane.f32.xlu1 %v50_v15  ;;  %48 = vmax.xlane.f32.xlu0 %v47_v16  ;;  %p410_p4 = pnand %p409_p3, %p403_p0 }
  0x20   :  { %123 = vperm.xlu1 %353, %v21_v17  }
  0x24   :  { %126 = vperm.xlu1 %353, %v22_v18  }
  0x25   :  { %120 = vperm.xlu0 %352, %v20_v19  }
  0x28   :  { %129 = vperm.xlu1 %353, %v23_v20  }
  0x2c   :  { %132 = vperm.xlu1 %353, %v24_v21  }
  0x30   :  { %135 = vperm.xlu1 %353, %v25_v22  }
  0x34   :  { %138 = vperm.xlu1 %353, %v26_v23  }
  0x38   :  { %141 = vperm.xlu1 %353, %v27_v24  }
  0x90   :  { %v37_v25 = vpop.xlane.xlu1 %36  ;;  %v31_v26 = vpop.xlane.xlu0 %30 }
  0x91   :  { %v500_v27 = vsub.f32 %v12_v1, %v31_v26  ;;  %v503_v29 = vsub.f32 %v14_v0, %v37_v25 }
  0x93   :  { %v61_v28 = vmul.f32 1.442695, %v500_v27  ;;  %v65_v36 = vmul.f32 1.442695, %v503_v29 }
  0x94   :  { %v40_v30 = vpop.xlane.xlu1 %39  ;;  %v34_v31 = vpop.xlane.xlu0 %33 }
  0x95   :  { %v505_v32 = vsub.f32 %v15_v2, %v40_v30  ;;  %v54_v33 = vsub.f32 %v13_v5, %v34_v31  ;;  %354 = vpow2.f32 %v61_v28  ;;  %v427_v2 = vmov 0.0  }
  0x97   :  { %v67_v34 = vmul.f32 1.442695, %v505_v32  ;;  %v63_v35 = vmul.f32 1.442695, %v54_v33 }
  0x98   :  { %v46_v37 = vpop.xlane.xlu1 %45  ;;  %v43_v38 = vpop.xlane.xlu0 %42 }
  0x99   :  { %356 = vpow2.f32 %v67_v34  ;;  %v509_v39 = vsub.f32 %v17_v9, %v46_v37  ;;  %v511_v40 = vsub.f32 %v16_v10, %v43_v38 }
  0x9a   :  { %358 = vpow2.f32 %v63_v35 }
  0x9b   :  { %v71_v41 = vmul.f32 1.442695, %v509_v39  ;;  %v69_v42 = vmul.f32 1.442695, %v511_v40  ;;  %360 = vpow2.f32 %v65_v36 }
  0x9c   :  { %v52_v43 = vpop.xlane.xlu1 %51  ;;  %v49_v44 = vpop.xlane.xlu0 %48 }
  0x9d   :  { %362 = vpow2.f32 %v71_v41  ;;  %v515_v45 = vsub.f32 %v19_v13, %v52_v43  ;;  %v517_v46 = vsub.f32 %v18_v14, %v49_v44 }
  0x9e   :  { %364 = vpow2.f32 %v69_v42 }
  0x9f   :  { %v75_v47 = vmul.f32 1.442695, %v515_v45  ;;  %v73_v49 = vmul.f32 1.442695, %v517_v46  ;;  %v355_v50 = vpop.eup %354 }
  0xa0   :  { %v124_v51 = vpop.permute.xlu1 %123  ;;  %v77_v52 = vsel %vm28_vm0, %v355_v50, 0.0 }
  0xa1   :  { %366 = vpow2.f32 %v75_v47  ;;  %78 = vadd.xlane.f32.xlu1 %v77_v52  ;;  %vm144_vm1 = vcmp.eq.s32.totalorder %v118_v54, %v124_v51 }
  0xa2   :  { %368 = vpow2.f32 %v73_v49  ;;  %v340_v3 = vsel %vm144_vm1, 1.0, %v427_v2 }
  0xa3   :  { %v357_v53 = vpop.eup %356  ;;  %v168_v9 = vmul.f32 %v340_v3, %v54_v33 }
  0xa4   :  { %v359_v55 = vpop.eup %358  ;;  %v127_v56 = vpop.permute.xlu1 %126  ;;  %v86_v57 = vsel %vm28_vm0, %v357_v53, 0.0 }
  0xa5   :  { %v80_v58 = vsel %vm28_vm0, %v359_v55, 0.0  ;;  %v361_v59 = vpop.eup %360  ;;  %87 = vadd.xlane.f32.xlu1 %v86_v57  ;;  %v121_v62 = vpop.permute.xlu0 %120  ;;  %vm145_vm4 = vcmp.eq.s32.totalorder %v118_v54, %v127_v56  ;;  %v178_v14 = vsel %vm28_vm0, %v168_v9, 0.0 }
  0xa6   :  { %81 = vadd.xlane.f32.xlu0 %v80_v58  ;;  %v83_v1 = vsel %vm28_vm0, %v361_v59, 0.0  ;;  %vm143_vm2 = vcmp.eq.s32.totalorder %v118_v54, %v121_v62  ;;  %v341_v17 = vsel %vm145_vm4, 1.0, %v427_v2 }
  0xa7   :  { %v363_v60 = vpop.eup %362  ;;  %v339_v10 = vsel %vm143_vm2, 1.0, %v427_v2  ;;  %v169_v23 = vmul.f32 %v341_v17, %v503_v29 }
  0xa8   :  { %v365_v61 = vpop.eup %364  ;;  %v130_v63 = vpop.permute.xlu1 %129  ;;  %v92_v0 = vsel %vm28_vm0, %v363_v60, 0.0  ;;  %v167_v16 = vmul.f32 %v339_v10, %v500_v27 }
  0xa9   :  { %93 = vadd.xlane.f32.xlu1 %v92_v0  ;;  %vm146_vm3 = vcmp.eq.s32.totalorder %v118_v54, %v130_v63  ;;  %v89_v5 = vsel %vm28_vm0, %v365_v61, 0.0  ;;  %v181_v27 = vsel %vm28_vm0, %v169_v23, 0.0 }
  0xaa   :  { %84 = vadd.xlane.f32.xlu0 %v83_v1  ;;  %v342_v11 = vsel %vm146_vm3, 1.0, %v427_v2  ;;  %v175_v21 = vsel %vm28_vm0, %v167_v16, 0.0 }
  0xab   :  { %v367_v4 = vpop.eup %366  ;;  %v170_v15 = vmul.f32 %v342_v11, %v505_v32 }
  0xac   :  { %v369_v6 = vpop.eup %368  ;;  %v133_v7 = vpop.permute.xlu1 %132  ;;  %v98_v8 = vsel %vm28_vm0, %v367_v4, 0.0 }
  0xad   :  { %99 = vadd.xlane.f32.xlu1 %v98_v8  ;;  %v95_v12 = vsel %vm28_vm0, %v369_v6, 0.0  ;;  %vm147_vm6 = vcmp.eq.s32.totalorder %v118_v54, %v133_v7  ;;  %v184_v20 = vsel %vm28_vm0, %v170_v15, 0.0 }
  0xae   :  { %90 = vadd.xlane.f32.xlu0 %v89_v5  ;;  %v343_v24 = vsel %vm147_vm6, 1.0, %v427_v2 }
  0xaf   :  { %v171_v28 = vmul.f32 %v343_v24, %v511_v40 }
  0xb0   :  { %v136_v13 = vpop.permute.xlu1 %135 }
  0xb1   :  { %vm148_vm5 = vcmp.eq.s32.totalorder %v118_v54, %v136_v13  ;;  %179 = vadd.xlane.f32.xlu1 %v178_v14  ;;  %v187_v29 = vsel %vm28_vm0, %v171_v28, 0.0 }
  0xb2   :  { %v344_v18 = vsel %vm148_vm5, 1.0, %v427_v2  ;;  %96 = vadd.xlane.f32.xlu0 %v95_v12 }
  0xb3   :  { %v172_v22 = vmul.f32 %v344_v18, %v509_v39 }
  0xb4   :  { %v139_v19 = vpop.permute.xlu1 %138 }
  0xb5   :  { %185 = vadd.xlane.f32.xlu1 %v184_v20  ;;  %vm149_vm7 = vcmp.eq.s32.totalorder %v118_v54, %v139_v19  ;;  %v190_v26 = vsel %vm28_vm0, %v172_v22, 0.0 }
  0xb6   :  { %176 = vadd.xlane.f32.xlu0 %v175_v21  ;;  %v345_v30 = vsel %vm149_vm7, 1.0, %v427_v2 }
  0xb7   :  { %v173_v34 = vmul.f32 %v345_v30, %v517_v46 }
  0xb8   :  { %v142_v25 = vpop.permute.xlu1 %141 }
  0xb9   :  { %vm150_vm8 = vcmp.eq.s32.totalorder %v118_v54, %v142_v25  ;;  %191 = vadd.xlane.f32.xlu1 %v190_v26  ;;  %v193_v35 = vsel %vm28_vm0, %v173_v34, 0.0 }
  0xba   :  { %v346_v31 = vsel %vm150_vm8, 1.0, %v427_v2  ;;  %182 = vadd.xlane.f32.xlu0 %v181_v27 }
  0xbb   :  { %v174_v32 = vmul.f32 %v346_v31, %v515_v45 }
  0xbd   :  { %v196_v33 = vsel %vm28_vm0, %v174_v32, 0.0 }
  0xbe   :  { %188 = vadd.xlane.f32.xlu0 %v187_v29  ;;  %197 = vadd.xlane.f32.xlu1 %v196_v33 }
  0xc2   :  { %194 = vadd.xlane.f32.xlu0 %v193_v35 }
 0x12e   :  { %v79_v36 = vpop.xlane.xlu1 %78 }
 0x12f   :  { %370 = vlog2.f32 %v79_v36 }
 0x132   :  { %v88_v37 = vpop.xlane.xlu1 %87 }
 0x133   :  { %v82_v38 = vpop.xlane.xlu0 %81  ;;  %372 = vlog2.f32 %v88_v37 }
 0x134   :  { %374 = vlog2.f32 %v82_v38 }
 0x136   :  { %v94_v39 = vpop.xlane.xlu1 %93 }
 0x137   :  { %v85_v40 = vpop.xlane.xlu0 %84  ;;  %376 = vlog2.f32 %v94_v39 }
 0x138   :  { %378 = vlog2.f32 %v85_v40 }
 0x139   :  { %v371_v43 = vpop.eup %370 }
 0x13a   :  { %v100_v41 = vpop.xlane.xlu1 %99  ;;  %v102_v52 = vmul.f32 0.6931472, %v371_v43 }
 0x13b   :  { %v91_v42 = vpop.xlane.xlu0 %90  ;;  %380 = vlog2.f32 %v100_v41 }
 0x13c   :  { %382 = vlog2.f32 %v91_v42 }
 0x13d   :  { %v373_v44 = vpop.eup %372 }
 0x13e   :  { %v375_v45 = vpop.eup %374  ;;  %v180_v46 = vpop.xlane.xlu1 %179  ;;  %v108_v49 = vmul.f32 0.6931472, %v373_v44 }
 0x13f   :  { %v97_v47 = vpop.xlane.xlu0 %96  ;;  %v104_v48 = vmul.f32 0.6931472, %v375_v45 }
 0x140   :  { %384 = vlog2.f32 %v97_v47 }
 0x141   :  { %v377_v50 = vpop.eup %376  ;;  %v544_v51 = vsub.f32 %v104_v48, %v180_v46 }
 0x142   :  { %v186_v53 = vpop.xlane.xlu1 %185  ;;  %v379_v55 = vpop.eup %378  ;;  %v112_v59 = vmul.f32 0.6931472, %v377_v50 }
 0x143   :  { %v177_v54 = vpop.xlane.xlu0 %176  ;;  %v208_v56 = vsub.f32 0.0, %v544_v51  ;;  %v547_v57 = vsub.f32 %v108_v49, %v186_v53  ;;  %v106_v2 = vmul.f32 0.6931472, %v379_v55 }
 0x144   :  { %v199_v58 = vsub.f32 %v102_v52, %v177_v54 }
 0x145   :  { %v381_v60 = vpop.eup %380  ;;  %v217_v61 = vmul.f32 1.442695, %v208_v56  ;;  %v210_v62 = vsub.f32 0.0, %v547_v57 }
 0x146   :  { %v207_v63 = vsub.f32 0.0, %v199_v58  ;;  %v383_v0 = vpop.eup %382  ;;  %v192_v1 = vpop.xlane.xlu1 %191  ;;  %v116_v4 = vmul.f32 0.6931472, %v381_v60 }
 0x147   :  { %v183_v3 = vpop.xlane.xlu0 %182  ;;  %386 = vpow2.f32 %v217_v61  ;;  %v221_v5 = vmul.f32 1.442695, %v210_v62  ;;  %v550_v7 = vsub.f32 %v112_v59, %v192_v1  ;;  %v110_v10 = vmul.f32 0.6931472, %v383_v0 }
 0x148   :  { %v215_v6 = vmul.f32 1.442695, %v207_v63  ;;  %v201_v8 = vsub.f32 %v106_v2, %v183_v3 }
 0x149   :  { %388 = vpow2.f32 %v221_v5  ;;  %v212_v9 = vsub.f32 0.0, %v550_v7 }
 0x14a   :  { %v385_v11 = vpop.eup %384  ;;  %390 = vpow2.f32 %v215_v6  ;;  %v209_v12 = vsub.f32 0.0, %v201_v8 }
 0x14b   :  { %v189_v13 = vpop.xlane.xlu0 %188  ;;  %v198_v14 = vpop.xlane.xlu1 %197  ;;  %v225_v15 = vmul.f32 1.442695, %v212_v9  ;;  %v114_v21 = vmul.f32 0.6931472, %v385_v11 }
 0x14c   :  { %v203_v16 = vsub.f32 %v110_v10, %v189_v13  ;;  %v553_v17 = vsub.f32 %v116_v4, %v198_v14  ;;  %v219_v18 = vmul.f32 1.442695, %v209_v12 }
 0x14d   :  { %392 = vpow2.f32 %v225_v15 }
 0x14e   :  { %v211_v19 = vsub.f32 0.0, %v203_v16  ;;  %v214_v20 = vsub.f32 0.0, %v553_v17  ;;  %394 = vpow2.f32 %v219_v18 }
 0x14f   :  { %v195_v22 = vpop.xlane.xlu0 %194 }
 0x150   :  { %v223_v23 = vmul.f32 1.442695, %v211_v19  ;;  %v229_v24 = vmul.f32 1.442695, %v214_v20  ;;  %v205_v25 = vsub.f32 %v114_v21, %v195_v22 }
 0x151   :  { %v387_v26 = vpop.eup %386 }
 0x152   :  { %396 = vpow2.f32 %v223_v23  ;;  %v213_v27 = vsub.f32 0.0, %v205_v25  ;;  %v232_v28 = vsub.f32 1.0, %v387_v26 }
 0x153   :  { %398 = vpow2.f32 %v229_v24  ;;  %v389_v30 = vpop.eup %388 }
 0x154   :  { %v227_v31 = vmul.f32 1.442695, %v213_v27  ;;  %v391_v32 = vpop.eup %390  ;;  %v240_v29 = vmax.f32 %v232_v28, 0.0  ;;  %v234_v33 = vsub.f32 1.0, %v389_v30 }
 0x155   :  { %v231_v34 = vsub.f32 1.0, %v391_v32 }
 0x156   :  { %400 = vpow2.f32 %v227_v31  ;;  %v248_v35 = vmul.f32 %v240_v29, %v240_v29  ;;  %v242_v37 = vmax.f32 %v234_v33, 0.0 }
 0x157   :  { %v393_v36 = vpop.eup %392  ;;  %v239_v38 = vmax.f32 %v231_v34, 0.0 }
 0x158   :  { %v395_v39 = vpop.eup %394  ;;  %v236_v40 = vsub.f32 1.0, %v393_v36  ;;  %v256_v43 = vmul.f32 %v248_v35, %v544_v51  ;;  %v250_v45 = vmul.f32 %v242_v37, %v242_v37 }
 0x159   :  { %v247_v41 = vmul.f32 %v239_v38, %v239_v38  ;;  %v233_v42 = vsub.f32 1.0, %v395_v39 }
 0x15a   :  { %v244_v47 = vmax.f32 %v236_v40, 0.0  ;;  %v300_v55 = vsel %vm298_vm9, %v256_v43, 0.0  ;;  %v258_v60 = vmul.f32 %v250_v45, %v547_v57 }
 0x15b   :  { %v255_v46 = vmul.f32 %v247_v41, %v199_v58  ;;  %v241_v48 = vmax.f32 %v233_v42, 0.0 }
 0x15c   :  { %v397_v44 = vpop.eup %396  ;;  %v252_v61 = vmul.f32 %v244_v47, %v244_v47  ;;  %v304_v5 = vsel %vm298_vm9, %v258_v60, 0.0 }
 0x15d   :  { %v399_v49 = vpop.eup %398  ;;  %v235_v50 = vsub.f32 1.0, %v397_v44  ;;  %v299_v52 = vsel %vm298_vm9, %v255_v46, 0.0  ;;  %v249_v53 = vmul.f32 %v241_v48, %v241_v48 }
 0x15e   :  { %v238_v54 = vsub.f32 1.0, %v399_v49  ;;  %v301_v63 = vadd.f32 %v300_v55, %v299_v52  ;;  %v260_v6 = vmul.f32 %v252_v61, %v550_v7 }
 0x15f   :  { %v243_v56 = vmax.f32 %v235_v50, 0.0  ;;  %v257_v62 = vmul.f32 %v249_v53, %v201_v8 }
 0x160   :  { %v401_v59 = vpop.eup %400  ;;  %v246_v51 = vmax.f32 %v238_v54, 0.0  ;;  %v308_v13 = vsel %vm298_vm9, %v260_v6, 0.0 }
 0x161   :  { %v251_v0 = vmul.f32 %v243_v56, %v243_v56  ;;  %v237_v58 = vsub.f32 1.0, %v401_v59  ;;  %v302_v1 = vsel %vm298_vm9, %v257_v62, 0.0 }
 0x162   :  { %v303_v2 = vadd.f32 %v302_v1, %v301_v63  ;;  %v254_v9 = vmul.f32 %v246_v51, %v246_v51 }
 0x163   :  { %v259_v3 = vmul.f32 %v251_v0, %v203_v16  ;;  %v245_v4 = vmax.f32 %v237_v58, 0.0 }
 0x164   :  { %v305_v10 = vadd.f32 %v304_v5, %v303_v2  ;;  %v262_v14 = vmul.f32 %v254_v9, %v553_v17 }
 0x165   :  { %v306_v11 = vsel %vm298_vm9, %v259_v3, 0.0  ;;  %v253_v57 = vmul.f32 %v245_v4, %v245_v4 }
 0x166   :  { %v307_v12 = vadd.f32 %v306_v11, %v305_v10  ;;  %v312_v19 = vsel %vm298_vm9, %v262_v14, 0.0 }
 0x167   :  { %v261_v8 = vmul.f32 %v253_v57, %v205_v25 }
 0x168   :  { %v309_v15 = vadd.f32 %v308_v13, %v307_v12 }
 0x169   :  { %v310_v18 = vsel %vm298_vm9, %v261_v8, 0.0 }
 0x16a   :  { %v311_v16 = vadd.f32 %v310_v18, %v309_v15 }
 0x16c   :  { %v313_v20 = vadd.f32 %v312_v19, %v311_v16 }
 0x16e   :  { %314 = vadd.xlane.f32.xlu0 %v313_v20 }
 0x1fb   :  { %v315_v7 = vpop.xlane.xlu0 %314 }
 0x1fc   :  { %v316_v21 = vrot.slane %v315_v7, 4 }
 0x1fe   :  { %v317_v22 = vadd.f32 %v316_v21, %v315_v7 }
 0x200   :  { %v318_v23 = vrot.slane %v317_v22, 2 }
 0x202   :  { %v319_v24 = vadd.f32 %v318_v23, %v317_v22 }
 0x204   :  { %v320_v26 = vrot.slane %v319_v24, 1 }
 0x206   :  { %v321_v27 = vadd.f32 %v320_v26, %v319_v24 }
 0x208   :  { %347 = vpush %v321_v27 }
 0x239   :  { %s348_s13 = spop %347 }
 0x23a   :  { %v323_v17 = vstv %s348_s13 }
 0x23b   :  { %324 = vst [vmem:[#allocation2] sm:$0x1] %v323_v17 }
 0x23c   :  { %413 = shalt.err (!%p410_p4)
}
 0x23d   :  { %s414_s18 = scalar_lea.hbm %s582_s2, 16 }
 0x23e   :  { %p415_p5 = scmp.ne.s32.totalorder %s582_s2, %s414_s18  ;;  %p418_p6 = scmp.lt.u32.totalorder %s414_s18, %s582_s2 }
 0x240   :  { %p420_p7 = pnand %p418_p6, %p415_p5 }
 0x242   :  { %423 = shalt.err (!%p420_p7)
}
 0x243   :  { %334 = dma.vmem_to_hbm [thread:$0]  %s332_s12, 16, %s582_s2, [#allocation3]  }
 0x244   :  { %424 = dma.done.wait [#allocation3], 16  }
 0x245   :  { %425 = vsyncadd [#allocation3], 4294967280 }
 0x246   :  { %338 = vsyncpa [#allocation3], 1 }

</bundles_post_ra>
